<compile_context>
chip_gen: v6e
topology: v6e:2x2x1
jax: 0.10.0
libtpu: 0.0.40
codegen_flags: <defaults>
</compile_context>

<pallas_src>
import numpy as np
import jax
import jax.numpy as jnp
from jax.experimental import pallas as pl
from jax.experimental.pallas import tpu as pltpu


def _flatten_copy_kernel(x_ref, o_ref):
    # Flatten is a contiguous reshape: the kernel body is a single whole-block
    # lane-dense assignment -> unmasked vector loads/stores, one rectangular
    # DMA in / one out per grid step, auto double-buffered.
    o_ref[...] = x_ref[...]


def _flatten_out_shape(x_shape, start_dim, end_dim):
    """Replicates the module's end_dim remapping + torch.flatten shape math."""
    nd = len(x_shape)
    e = end_dim
    if end_dim == -1:
        e = end_dim - 1          # -> -2, keep trailing time axis
    elif end_dim == nd:
        e = -2
    elif end_dim == nd - 1:
        e = -2
    s = start_dim % nd
    e = e % nd
    assert 0 <= s <= e < nd, (s, e, nd)
    return x_shape[:s] + (int(np.prod(x_shape[s:e + 1])),) + x_shape[e + 1:]


def flatten_forward(x, start_dim=1, end_dim=-1):
    """Pallas equivalent of the PyTorch Flatten module's forward pass."""
    out_shape = _flatten_out_shape(x.shape, start_dim, end_dim)
    total = int(x.size)
    itemsize = x.dtype.itemsize

    # Pick a lane width C (multiple of 128) so the slab is full-(8,128) tiles.
    # Prefer the widest C that still leaves >= 8 rows (full sublane tiles).
    C = 0
    for cand in (2048, 1024, 512, 256, 128):
        if total % cand == 0 and total // cand >= 8:
            C = cand
            break
    if C == 0:
        if total % 128 == 0:
            C = 128                      # tiny tensor: R < 8, single full block
        else:
            # No 128-lane factorization: flatten of a contiguous array is a
            # metadata-only reshape, which is the optimal implementation here.
            return jnp.reshape(x, out_shape)

    R = total // C
    x2 = jnp.reshape(x, (R, C))          # contiguous reshape: metadata only

    # ~4 MiB blocks: (in + out) x double-buffering = 16 MiB, well under the
    # explicit 32 MiB scoped-VMEM request on every generation, and wide enough
    # (>= 512 lanes, thousands of sublanes) to sit at the HBM roofline while
    # amortizing the ~0.35 us per-grid-step overhead.
    target_block_bytes = 4 * 1024 * 1024
    row_tile = max(8, (target_block_bytes // (C * itemsize)) // 8 * 8)
    row_tile = min(row_tile, R)
    if row_tile == R and R > 8:
        # Guarantee >= 2 grid steps so both v7x TensorCores get DMA work.
        row_tile = max(8, ((R // 2 + 7) // 8) * 8)
    grid = (pl.cdiv(R, row_tile),)       # ragged last block handled by Pallas

    out2 = pl.pallas_call(
        _flatten_copy_kernel,
        out_shape=jax.ShapeDtypeStruct((R, C), x.dtype),
        grid_spec=pltpu.PrefetchScalarGridSpec(
            num_scalar_prefetch=0,
            grid=grid,
            in_specs=[pl.BlockSpec((row_tile, C), lambda i: (i, 0))],
            out_specs=pl.BlockSpec((row_tile, C), lambda i: (i, 0)),
        ),
        compiler_params=pltpu.CompilerParams(
            # Independent chunks -> megacore-shardable; keep default
            # double-buffering (a streaming memcpy has nothing to hide DMA
            # behind, so VMEM is better spent on block size).
            dimension_semantics=("parallel",),
            vmem_limit_bytes=32 * 1024 * 1024),
        cost_estimate=pl.CostEstimate(
            flops=0, transcendentals=0,
            bytes_accessed=2 * total * itemsize),
    )(x2)

    # Final contiguous reshape to the module's output shape (metadata only).
    return jnp.reshape(out2, out_shape)


if __name__ == "__main__":
    key = jax.random.PRNGKey(0)
    # conv-output-like shape: batch=2, channels=4, spatial=8x8, time=8
    x = jax.random.normal(key, (2, 4, 8, 8, 8), dtype=jnp.float32)

    out = flatten_forward(x, start_dim=1, end_dim=-1)
    out = jax.block_until_ready(out)

    # reference semantics: torch.flatten(x, 1, -2) == reshape to (N, C*H*W, T)
    ref = jnp.reshape(x, (x.shape[0], -1, x.shape[-1]))
    assert out.shape == ref.shape, (out.shape, ref.shape)
    assert out.dtype == ref.dtype
    np.testing.assert_allclose(np.asarray(out), np.asarray(ref), rtol=0, atol=0)

    print("KERNEL_OK")
</pallas_src>

<mosaic_0001>
module attributes {stable_mosaic.version = 11 : i64} {
  func.func @_flatten_copy_kernel(%arg0: i32, %arg1: memref<8x512xf32, #tpu.memory_space<vmem>>, %arg2: memref<8x512xf32, #tpu.memory_space<vmem>>) attributes {dimension_semantics = [#tpu.dimension_semantics<parallel>], iteration_bounds = array<i64: 1>, scalar_prefetch = 0 : i64, scratch_operands = 0 : i64, tpu.core_type = #tpu.core_type<tc>, window_params = [{transform_indices = @transform_0, window_bounds = array<i64: 8, 512>}, {transform_indices = @transform_1, window_bounds = array<i64: 8, 512>}]} {
    %c0 = arith.constant 0 : index
    %c0_0 = arith.constant 0 : index
    %0 = vector.load %arg1[%c0, %c0_0] : memref<8x512xf32, #tpu.memory_space<vmem>>, vector<8x512xf32>
    %c0_1 = arith.constant 0 : index
    %c0_2 = arith.constant 0 : index
    %1 = vector.load %arg2[%c0_1, %c0_2] : memref<8x512xf32, #tpu.memory_space<vmem>>, vector<8x512xf32>
    tpu.vector_store %arg2[%c0_1, %c0_2], %0 {strides = array<i32>} : memref<8x512xf32, #tpu.memory_space<vmem>>, vector<8x512xf32>,
    return
  }
  func.func @transform_0(%arg0: i32) -> (i32, i32) {
    %c0_i32 = arith.constant 0 : i32
    %c0_i32_0 = arith.constant 0 : i32
    return %arg0, %c0_i32 : i32, i32
  }
  func.func @transform_1(%arg0: i32) -> (i32, i32) {
    %c0_i32 = arith.constant 0 : i32
    %c0_i32_0 = arith.constant 0 : i32
    return %arg0, %c0_i32 : i32, i32
  }
}

</mosaic_0001>

<bundles_post_ra>
// kernel: tpu_custom_call.1
= control target key start
LH: loop header
LB: loop body
LE: loop exit
PB: predicated region body
PF: predicated region fallthrough
CT: control target
= control target key end

     0   :  { %6 = vsyncpa [#allocation3], 0  ;;  %s108_s0 = inlined_call_operand.hbm [shape: f32[8,512], index: 0, kind: input, shape index: {}]   ;;  %s109_s1 = inlined_call_operand.hbm [shape: f32[8,512], index: 1, kind: output, shape index: {}]  }
   0x1   :  { %7 = vsyncpa [#allocation4], 0  ;;  %s90_s6 = smov [#allocation2]  }
   0x2   :  { %s14_s7 = sshll.u32 %s90_s6, 4  ;;  %s15_s7 = int_to_ptr.vmem [resolvable:$true] %s14_s7 }
   0x3   :  { %s54_s8 = scalar_lea.vmem %s15_s7, 512  ;;  %p59_p1 = scmp.lt.s32.totalorder %s15_s7, %s15_s7 }
   0x4   :  { %p55_p0 = scmp.ne.s32.totalorder %s15_s7, %s54_s8  ;;  %p60_p2 = scmp.lt.s32.totalorder %s54_s8, %s54_s8 }
   0x6   :  { %p61_p3 = por %p60_p2, %p59_p1 }
   0x8   :  { %p62_p4 = pnand %p61_p3, %p55_p0 }
   0xa   :  { %65 = shalt.err (!%p62_p4)
}
   0xb   :  { %17 = dma.hbm_to_vmem [thread:$0]  %s108_s0, 512, %s15_s7, [#allocation3]  }
   0xc   :  { %86 = dma.done.wait [#allocation3], 512  }
   0xd   :  { %87 = vsyncadd [#allocation3], 4294966784  ;;  %s91_s11 = smov [#allocation5]   ;;  %v21_v0 = vld [vmem:[#allocation2] sm:$0xff]  ;;  %v22_v1 = vld [vmem:[#allocation2 + $0x8] sm:$0xff] }
   0xe   :  { %s35_s12 = sshll.u32 %s91_s11, 4  ;;  %v23_v2 = vld [vmem:[#allocation2 + $0x10] sm:$0xff]  ;;  %25 = vst [vmem:[#allocation5] sm:$0xff] %v21_v0  ;;  %26 = vst [vmem:[#allocation5 + $0x8] sm:$0xff] %v22_v1  ;;  %v24_v3 = vld [vmem:[#allocation2 + $0x18] sm:$0xff]  ;;  %s36_s12 = int_to_ptr.vmem [resolvable:$true] %s35_s12 }
   0xf   :  { %27 = vst [vmem:[#allocation5 + $0x10] sm:$0xff] %v23_v2  ;;  %28 = vst [vmem:[#allocation5 + $0x18] sm:$0xff] %v24_v3  ;;  %s66_s13 = scalar_lea.vmem %s36_s12, 512  ;;  %p71_p6 = scmp.lt.s32.totalorder %s36_s12, %s36_s12 }
  0x10   :  { %p67_p5 = scmp.ne.s32.totalorder %s36_s12, %s66_s13  ;;  %p72_p7 = scmp.lt.s32.totalorder %s66_s13, %s66_s13 }
  0x12   :  { %p73_p8 = por %p72_p7, %p71_p6 }
  0x14   :  { %p74_p9 = pnand %p73_p8, %p67_p5 }
  0x16   :  { %77 = shalt.err (!%p74_p9)
}
  0x17   :  { %38 = dma.vmem_to_hbm [thread:$0]  %s36_s12, 512, %s109_s1, [#allocation4]  }
  0x18   :  { %88 = dma.done.wait [#allocation4], 512  }
  0x19   :  { %89 = vsyncadd [#allocation4], 4294966784 }
  0x1a   :  { %42 = vsyncpa [#allocation3], 1 }
  0x1b   :  { %43 = vsyncpa [#allocation4], 1 }

</bundles_post_ra>
